<compile_context>
chip_gen: v6e
topology: v6e:2x2x1
jax: 0.10.0
libtpu: 0.0.40
codegen_flags: <defaults>
</compile_context>

<pallas_src>
import jax
import jax.numpy as jnp
from jax.experimental import pallas as pl
from jax.experimental.pallas import tpu as pltpu


def _round_up(x: int, m: int) -> int:
    return ((x + m - 1) // m) * m


def _sublane_multiple(dtype) -> int:
    # Sub-32-bit dtypes pack along sublanes; keep batch tiles aligned to that.
    return {4: 8, 2: 16, 1: 32}.get(jnp.dtype(dtype).itemsize, 8)


def mlp_head_kernel(x_ref, w1_ref, b1_ref, w2_ref, b2_ref, o_ref):
    # First linear: MXU operands in the weight dtype (bf16 if prepared that
    # way), f32 accumulation.
    w1 = w1_ref[...]
    h = jnp.dot(x_ref[...].astype(w1.dtype), w1, preferred_element_type=jnp.float32)
    # Bias + tanh in f32 on the VPU/EUP (v5e-safe; EUP tanh is a free slot).
    h = jnp.tanh(h + b1_ref[...].astype(jnp.float32))
    # Second linear: cast hidden to the weight dtype for the MXU, f32 acc.
    w2 = w2_ref[...]
    out = jnp.dot(h.astype(w2.dtype), w2, preferred_element_type=jnp.float32)
    out = out + b2_ref[...].astype(jnp.float32)
    o_ref[...] = out.astype(o_ref.dtype)


def prepare_classification_head_params(w1, b1, w2, b2, *, mxu_dtype=None):
    """One-time parameter prep -- call once at init, NOT per forward pass.

    w1: (D_in, D_in), w2: (D_in, D_out), stored already transposed relative to
    PyTorch nn.Linear so the kernel computes tanh(x @ w1 + b1) @ w2 + b2.
    Biases are reshaped to (1, D) and pre-cast to f32 (elementwise math is f32
    on every generation).  Optionally cast weights to `mxu_dtype`
    (e.g. jnp.bfloat16) to hit the native bf16 MXU path on v6e/v7x and halve
    weight HBM/VMEM traffic.
    """
    if mxu_dtype is not None:
        w1 = w1.astype(mxu_dtype)
        w2 = w2.astype(mxu_dtype)
    b1 = jnp.asarray(b1, jnp.float32).reshape(1, -1)
    b2 = jnp.asarray(b2, jnp.float32).reshape(1, -1)
    return w1, b1, w2, b2


def classification_head_mlp(x, w1, b1, w2, b2, *, max_batch_tile=256,
                            single_buffer_weights=False):
    """x: (B, D_in); w1: (D_in, Dh); b1: (1, Dh); w2: (Dh, D_out); b2: (1, D_out)."""
    B, D_in = x.shape
    Dh = w1.shape[1]
    D_out = w2.shape[1]
    if b1.ndim == 1:
        b1 = b1.reshape(1, -1)
    if b2.ndim == 1:
        b2 = b2.reshape(1, -1)

    # Batch tile: multiple of the sublane packing, capped at max_batch_tile and
    # at ~B/2 so the grid has >=2 steps whenever B allows it (v7x megacore).
    sub = _sublane_multiple(x.dtype)
    TB = max(sub, min(_round_up(max_batch_tile, sub), _round_up(-(-B // 2), sub)))
    TB = min(TB, _round_up(B, sub))
    grid = (pl.cdiv(B, TB),)

    # Weights/biases use constant index_maps -> VMEM-resident across steps.
    # For very large hidden dims, single-buffering them halves their VMEM
    # footprint (matters under v7x's 64 MiB physical VMEM).
    if single_buffer_weights:
        def const_spec(shape):
            return pl.BlockSpec(shape, lambda i: (0, 0), pipeline_mode=pl.Buffered(1))
    else:
        def const_spec(shape):
            return pl.BlockSpec(shape, lambda i: (0, 0))
    # TODO(synk): for D_in/Dh large enough that 2x(w1+w2) overflows VMEM, add an
    # "arbitrary" grid axis tiling the contraction dim instead of resident weights.

    isz = lambda a: jnp.dtype(a.dtype).itemsize
    bytes_accessed = (x.size * isz(x) + w1.size * isz(w1) + b1.size * isz(b1)
                      + w2.size * isz(w2) + b2.size * isz(b2) + B * D_out * isz(x))
    cost = pl.CostEstimate(
        flops=2 * B * D_in * Dh + 2 * B * Dh * D_out,
        transcendentals=B * Dh,
        bytes_accessed=bytes_accessed,
    )

    return pl.pallas_call(
        mlp_head_kernel,
        out_shape=jax.ShapeDtypeStruct((B, D_out), x.dtype),
        grid_spec=pl.GridSpec(
            grid=grid,
            in_specs=[
                # x: tiled over batch; last dim is the full feature dim.
                pl.BlockSpec((TB, D_in), lambda i: (i, 0)),
                const_spec((D_in, Dh)),
                const_spec((1, Dh)),
                const_spec((Dh, D_out)),
                const_spec((1, D_out)),
            ],
            # Full-D_out block (== array dim) -> no lane padding, no post-slice.
            out_specs=pl.BlockSpec((TB, D_out), lambda i: (i, 0)),
        ),
        compiler_params=pltpu.CompilerParams(
            # Batch tiles are independent -> shard across v7x's two TensorCores.
            dimension_semantics=("parallel",),
            # v5e default scoped VMEM is 16 MiB; 48 MiB fits all generations.
            vmem_limit_bytes=48 * 1024 * 1024,
        ),
        cost_estimate=cost,
    )(x, w1, b1, w2, b2)


def reference(x, w1, b1, w2, b2):
    h = jnp.tanh(x.astype(jnp.float32) @ w1.astype(jnp.float32) + b1.astype(jnp.float32))
    return (h @ w2.astype(jnp.float32) + b2.astype(jnp.float32)).astype(x.dtype)


if __name__ == "__main__":
    # Small shapes consistent with the module: batch=8, inputdim=32, outdim=8.
    B, D_in, D_out = 8, 32, 8
    key = jax.random.PRNGKey(0)
    kx, kw1, kb1, kw2, kb2 = jax.random.split(key, 5)

    x = jax.random.normal(kx, (B, D_in), dtype=jnp.float32)
    # Deterministic synthetic parameters (kaiming-uniform-like scale, not a checkpoint).
    lim1 = 1.0 / (D_in ** 0.5)
    w1 = jax.random.uniform(kw1, (D_in, D_in), minval=-lim1, maxval=lim1, dtype=jnp.float32)
    b1 = jax.random.uniform(kb1, (D_in,), minval=-lim1, maxval=lim1, dtype=jnp.float32)
    w2 = jax.random.uniform(kw2, (D_in, D_out), minval=-lim1, maxval=lim1, dtype=jnp.float32)
    b2 = jax.random.uniform(kb2, (D_out,), minval=-lim1, maxval=lim1, dtype=jnp.float32)

    # One-time parameter prep hoisted out of the hot path.
    p_w1, p_b1, p_w2, p_b2 = prepare_classification_head_params(w1, b1, w2, b2)

    # Main check at the module's natural small shape (f32 everywhere).
    out = jax.block_until_ready(classification_head_mlp(x, p_w1, p_b1, p_w2, p_b2))
    ref = reference(x, w1, b1, w2, b2)
    assert out.shape == (B, D_out)
    assert jnp.allclose(out, ref, atol=1e-5, rtol=1e-5), "mismatch vs reference (f32)"

    # Ragged-batch multi-step grid path: no host-side pad, partial last block.
    B2 = 200
    x2 = jax.random.normal(jax.random.PRNGKey(1), (B2, D_in), dtype=jnp.float32)
    out2 = jax.block_until_ready(
        classification_head_mlp(x2, p_w1, p_b1, p_w2, p_b2, max_batch_tile=64))
    ref2 = reference(x2, w1, b1, w2, b2)
    assert out2.shape == (B2, D_out)
    assert jnp.allclose(out2, ref2, atol=1e-5, rtol=1e-5), "mismatch vs reference (tiled)"

    # bf16-MXU-operand path: weights pre-cast to bf16 once, f32 accumulation,
    # f32 bias+tanh; compare against the f32 reference with a loose tolerance.
    q_w1, q_b1, q_w2, q_b2 = prepare_classification_head_params(
        w1, b1, w2, b2, mxu_dtype=jnp.bfloat16)
    out3 = jax.block_until_ready(classification_head_mlp(x, q_w1, q_b1, q_w2, q_b2))
    assert out3.shape == (B, D_out)
    assert jnp.allclose(out3, ref, atol=3e-2, rtol=3e-2), "mismatch vs reference (bf16 MXU)"

    print("KERNEL_OK")
</pallas_src>

<mosaic_0001>
module attributes {stable_mosaic.version = 11 : i64} {
  func.func @mlp_head_kernel(%arg0: i32, %arg1: memref<8x32xf32, #tpu.memory_space<vmem>>, %arg2: memref<32x32xf32, #tpu.memory_space<vmem>>, %arg3: memref<1x32xf32, #tpu.memory_space<vmem>>, %arg4: memref<32x8xf32, #tpu.memory_space<vmem>>, %arg5: memref<1x8xf32, #tpu.memory_space<vmem>>, %arg6: memref<8x8xf32, #tpu.memory_space<vmem>>) attributes {dimension_semantics = [#tpu.dimension_semantics<parallel>], iteration_bounds = array<i64: 1>, scalar_prefetch = 0 : i64, scratch_operands = 0 : i64, tpu.core_type = #tpu.core_type<tc>, window_params = [{transform_indices = @transform_0, window_bounds = array<i64: 8, 32>}, {pipeline_mode = #tpu.pipeline_mode<synchronous>, transform_indices = @transform_1, window_bounds = array<i64: 32, 32>}, {pipeline_mode = #tpu.pipeline_mode<synchronous>, transform_indices = @transform_2, window_bounds = array<i64: 1, 32>}, {pipeline_mode = #tpu.pipeline_mode<synchronous>, transform_indices = @transform_3, window_bounds = array<i64: 32, 8>}, {pipeline_mode = #tpu.pipeline_mode<synchronous>, transform_indices = @transform_4, window_bounds = array<i64: 1, 8>}, {transform_indices = @transform_5, window_bounds = array<i64: 8, 8>}]} {
    %c0 = arith.constant 0 : index
    %c0_0 = arith.constant 0 : index
    %0 = vector.load %arg2[%c0, %c0_0] : memref<32x32xf32, #tpu.memory_space<vmem>>, vector<32x32xf32>
    %c0_1 = arith.constant 0 : index
    %c0_2 = arith.constant 0 : index
    %1 = vector.load %arg1[%c0_1, %c0_2] : memref<8x32xf32, #tpu.memory_space<vmem>>, vector<8x32xf32>
    %cst = arith.constant dense<0.000000e+00> : vector<8x32xf32>
    %2 = tpu.matmul %1, %0, %cst {dimension_numbers = #tpu.dot_dimension_numbers<[1], [0], [0], [1], [0, 0, 1, 1], [], []>} : vector<8x32xf32>, vector<32x32xf32>, vector<8x32xf32> -> vector<8x32xf32>
    %c0_3 = arith.constant 0 : index
    %c0_4 = arith.constant 0 : index
    %3 = vector.load %arg3[%c0_3, %c0_4] : memref<1x32xf32, #tpu.memory_space<vmem>>, vector<1x32xf32>
    %4 = vector.broadcast %3 : vector<1x32xf32> to vector<8x32xf32>
    %5 = arith.addf %2, %4 : vector<8x32xf32>
    %6 = math.tanh %5 : vector<8x32xf32>
    %c0_5 = arith.constant 0 : index
    %c0_6 = arith.constant 0 : index
    %7 = vector.load %arg4[%c0_5, %c0_6] : memref<32x8xf32, #tpu.memory_space<vmem>>, vector<32x8xf32>
    %cst_7 = arith.constant dense<0.000000e+00> : vector<8x8xf32>
    %8 = tpu.matmul %6, %7, %cst_7 {dimension_numbers = #tpu.dot_dimension_numbers<[1], [0], [0], [1], [0, 0, 1, 1], [], []>} : vector<8x32xf32>, vector<32x8xf32>, vector<8x8xf32> -> vector<8x8xf32>
    %c0_8 = arith.constant 0 : index
    %c0_9 = arith.constant 0 : index
    %9 = vector.load %arg5[%c0_8, %c0_9] : memref<1x8xf32, #tpu.memory_space<vmem>>, vector<1x8xf32>
    %10 = vector.broadcast %9 : vector<1x8xf32> to vector<8x8xf32>
    %11 = arith.addf %8, %10 : vector<8x8xf32>
    %c0_10 = arith.constant 0 : index
    %c0_11 = arith.constant 0 : index
    %12 = vector.load %arg6[%c0_10, %c0_11] : memref<8x8xf32, #tpu.memory_space<vmem>>, vector<8x8xf32>
    tpu.vector_store %arg6[%c0_10, %c0_11], %11 {strides = array<i32>} : memref<8x8xf32, #tpu.memory_space<vmem>>, vector<8x8xf32>,
    return
  }
  func.func @transform_0(%arg0: i32) -> (i32, i32) {
    %c0_i32 = arith.constant 0 : i32
    %c0_i32_0 = arith.constant 0 : i32
    return %arg0, %c0_i32 : i32, i32
  }
  func.func @transform_1(%arg0: i32) -> (i32, i32) {
    %c0_i32 = arith.constant 0 : i32
    %c0_i32_0 = arith.constant 0 : i32
    %c0_i32_1 = arith.constant 0 : i32
    return %c0_i32, %c0_i32_0 : i32, i32
  }
  func.func @transform_2(%arg0: i32) -> (i32, i32) {
    %c0_i32 = arith.constant 0 : i32
    %c0_i32_0 = arith.constant 0 : i32
    %c0_i32_1 = arith.constant 0 : i32
    return %c0_i32, %c0_i32_0 : i32, i32
  }
  func.func @transform_3(%arg0: i32) -> (i32, i32) {
    %c0_i32 = arith.constant 0 : i32
    %c0_i32_0 = arith.constant 0 : i32
    %c0_i32_1 = arith.constant 0 : i32
    return %c0_i32, %c0_i32_0 : i32, i32
  }
  func.func @transform_4(%arg0: i32) -> (i32, i32) {
    %c0_i32 = arith.constant 0 : i32
    %c0_i32_0 = arith.constant 0 : i32
    %c0_i32_1 = arith.constant 0 : i32
    return %c0_i32, %c0_i32_0 : i32, i32
  }
  func.func @transform_5(%arg0: i32) -> (i32, i32) {
    %c0_i32 = arith.constant 0 : i32
    %c0_i32_0 = arith.constant 0 : i32
    return %arg0, %c0_i32 : i32, i32
  }
}

</mosaic_0001>

<bundles_post_ra>
// kernel: tpu_custom_call.1
= control target key start
LH: loop header
LB: loop body
LE: loop exit
PB: predicated region body
PF: predicated region fallthrough
CT: control target
= control target key end

     0   :  { %v271_v1 = vmov 0.0   ;;  %vm272_vm0 = vmmov 0   ;;  %s342_s0 = inlined_call_operand.vmem [shape: f32[8,32], index: 0, kind: input, shape index: {}]   ;;  %s343_s1 = inlined_call_operand.vmem [shape: f32[32,32], index: 1, kind: input, shape index: {}]   ;;  %s344_s2 = inlined_call_operand.vmem [shape: f32[1,32], index: 2, kind: input, shape index: {}]   ;;  %s345_s3 = inlined_call_operand.vmem [shape: f32[32,8], index: 3, kind: input, shape index: {}]   ;;  %s346_s4 = inlined_call_operand.vmem [shape: f32[1,8], index: 4, kind: input, shape index: {}]   ;;  %s347_s5 = inlined_call_operand.hbm [shape: f32[8,8], index: 5, kind: output, shape index: {}]  }
   0x1   :  { %v24_v0 = vld [vmem:[%s343_s1 + $0x18] sm:$0xff]  ;;  %222 = vmatprep.subr.mxu0 %v271_v1  ;;  %v23_v2 = vld [vmem:[%s343_s1 + $0x10] sm:$0xff]  ;;  %230 = vmatprep.mubr.msk.f32.mxu0 %vm272_vm0, %v271_v1 }
   0x2   :  { %223 = vmatpush3.msra.mxu0 %v24_v0  ;;  %233 = vmatprep.subr.mxu1 %v271_v1 }
   0x3   :  { %10 = vsyncpa [#allocation3], 0  ;;  %224 = vmatprep.subr.mxu0 %v271_v1  ;;  %v22_v3 = vld [vmem:[%s343_s1 + $0x8] sm:$0xff]  ;;  %241 = vmatprep.mubr.msk.f32.mxu1 %vm272_vm0, %v271_v1  ;;  %v21_v4 = vld [vmem:[%s343_s1] sm:$0xff]  ;;  %vm33_vm1 = vcmask 261120   ;;  %s273_s13 = smov [#allocation2]  }
   0x4   :  { %225 = vmatpush3.msra.mxu0 %v23_v2  ;;  %v25_v5 = vld [vmem:[%s342_s0] sm:$0xff]  ;;  %v111_v6 = vld [vmem:[%s345_s3 + $0x18] sm:$0xff]  ;;  %v110_v7 = vld [vmem:[%s345_s3 + $0x10] sm:$0xff]  ;;  %vm192_vm2 = vcmask 64512  }
   0x5   :  { %226 = vmatprep.subr.mxu0 %v271_v1  ;;  %234 = vmatpush3.msra.mxu1 %v111_v6  ;;  %v109_v8 = vld [vmem:[%s345_s3 + $0x8] sm:$0xff]  ;;  %v108_v9 = vld [vmem:[%s345_s3] sm:$0xff]  ;;  %s200_s3 = sshll.u32 %s273_s13, 4  ;;  %s201_s3 = int_to_ptr.vmem [resolvable:$true] %s200_s3 }
   0x6   :  { %227 = vmatpush3.msra.mxu0 %v22_v3  ;;  %235 = vmatprep.subr.mxu1 %v271_v1  ;;  %v208_v10 = vld [vmem:[%s344_s2] ss:$0 sm:$0xff]  ;;  %s249_s2 = scalar_lea.vmem %s201_s3, 128  ;;  %p254_p1 = scmp.lt.s32.totalorder %s201_s3, %s201_s3 }
   0x7   :  { %228 = vmatprep.subr.mxu0 %v271_v1  ;;  %236 = vmatpush3.msra.mxu1 %v110_v7  ;;  %v210_v15 = vld [vmem:[%s346_s4] ss:$0 sm:$0xff]  ;;  %p250_p0 = scmp.ne.s32.totalorder %s201_s3, %s249_s2  ;;  %p255_p2 = scmp.lt.s32.totalorder %s249_s2, %s249_s2 }
   0x8   :  { %229 = vmatpush3.msra.mxu0 %v21_v4  ;;  %237 = vmatprep.subr.mxu1 %v271_v1 }
   0x9   :  { %231 = vmatmul.mubr.msk.f32.vlgmr.msra.gmra.mxu0 %vm33_vm1, %v25_v5  ;;  %238 = vmatpush3.msra.mxu1 %v109_v8  ;;  %p256_p3 = por %p255_p2, %p254_p1 }
   0xa   :  { %239 = vmatprep.subr.mxu1 %v271_v1 }
   0xb   :  { %240 = vmatpush3.msra.mxu1 %v108_v9  ;;  %p257_p4 = pnand %p256_p3, %p250_p0 }
  0xc9   :  { %v103_v11 = vpop.f32.mrf.mxu0 }
  0xca   :  { %v104_v12 = vadd.f32 %v208_v10, %v103_v11 }
  0xcb   :  { %v232_v13 = vpop.f32.mrf.mxu0 }
  0xcc   :  { %247 = vtanh.f32 %v104_v12 }
  0xd9   :  { %v248_v14 = vpop.eup %247 }
  0xda   :  { %242 = vmatmul.mubr.msk.f32.vlgmr.msra.gmra.mxu1 %vm33_vm1, %v248_v14 }
 0x19a   :  { %v188_v16 = vpop.f32.mrf.mxu1 }
 0x19b   :  { %v189_v17 = vadd.f32 %v210_v15, %v188_v16 }
 0x19c   :  { %v243_v18 = vpop.f32.mrf.mxu1 }
 0x19d   :  { %193 = vst.msk [vmem:[#allocation2] sm:$0xff] %vm192_vm2, %v189_v17 }
 0x19e   :  { %260 = shalt.err (!%p257_p4)
}
 0x19f   :  { %203 = dma.vmem_to_hbm [thread:$0]  %s201_s3, 128, %s347_s5, [#allocation3]  }
 0x1a0   :  { %269 = dma.done.wait [#allocation3], 128  }
 0x1a1   :  { %270 = vsyncadd [#allocation3], 4294967168 }
 0x1a2   :  { %207 = vsyncpa [#allocation3], 1 }

</bundles_post_ra>
